<compile_context>
chip_gen: v7x
topology: tpu7x:2x2x1
jax: 0.10.0
libtpu: 0.0.40
codegen_flags: <defaults>
</compile_context>

<pallas_src>
from functools import partial

import jax
import jax.numpy as jnp
from jax.experimental import pallas as pl
from jax.experimental.pallas import tpu as pltpu


def _ca_layer_kernel(x_ref, w1t_ref, b1_ref, w2_ref, b2_ref, o_ref, *, inv_n):
    x = x_ref[0]                                                   # (C, N) in VMEM

    # ---- AdaptiveAvgPool2d(1): mean over the spatial (lane) axis -> (C, 1) --
    pooled = jnp.sum(x, axis=1, keepdims=True) * inv_n             # XLU lane reduce

    # ---- Conv2d(C -> mid, 1x1) on the pooled vector ------------------------
    #   h[m] = sum_c W1[m, c] * pooled[c] + b1[m]
    # w1t is (C, mid): broadcast pooled along lanes, reduce over sublanes.
    h = jnp.sum(w1t_ref[...] * pooled, axis=0, keepdims=True) + b1_ref[...]   # (1, mid)

    # ---- Conv2d(mid -> C, 1x1) ---------------------------------------------
    #   z[c] = sum_m W2[c, m] * h[m] + b2[c]
    z = jnp.sum(w2_ref[...] * h, axis=1, keepdims=True) + b2_ref[...]         # (C, 1)

    # ---- Sigmoid gate (exp goes to the EUP slot) ----------------------------
    s = 1.0 / (1.0 + jnp.exp(-z))                                  # (C, 1)

    # ---- Channel-wise rescale; lane-dense (N-wide) store --------------------
    o_ref[0] = (x * s).astype(o_ref.dtype)


def ca_layer_pallas(x, params):
    """x: (B, C, H, W) NCHW; params are the squeezed 1x1-conv weights/biases."""
    B, C, H, W = x.shape
    N = H * W
    w1 = params["w1"]                 # (mid, C)  conv1 weight (1x1 squeezed)
    b1 = params["b1"]                 # (mid,)
    w2 = params["w2"]                 # (C, mid)  conv2 weight (1x1 squeezed)
    b2 = params["b2"]                 # (C,)
    mid = w1.shape[0]

    x_flat = x.reshape(B, C, N)       # free reshape, channels-first layout kept
    w1t = jnp.transpose(w1)           # (C, mid)   -- tiny, done once by XLA
    b1_row = b1.reshape(1, mid)
    b2_col = b2.reshape(C, 1)

    kernel = partial(_ca_layer_kernel, inv_n=1.0 / float(N))
    out_flat = pl.pallas_call(
        kernel,
        out_shape=jax.ShapeDtypeStruct((B, C, N), x.dtype),
        grid=(B,),                                          # one fat step per batch
        in_specs=[
            pl.BlockSpec((1, C, N), lambda b: (b, 0, 0)),   # x     (lane-dense, N lanes)
            pl.BlockSpec((C, mid), lambda b: (0, 0)),       # W1^T  (resident; index const)
            pl.BlockSpec((1, mid), lambda b: (0, 0)),       # b1
            pl.BlockSpec((C, mid), lambda b: (0, 0)),       # W2
            pl.BlockSpec((C, 1), lambda b: (0, 0)),         # b2
        ],
        out_specs=pl.BlockSpec((1, C, N), lambda b: (b, 0, 0)),
        compiler_params=pltpu.CompilerParams(
            dimension_semantics=("parallel",)),             # batch shards across TCs (v7x)
    )(x_flat, w1t, b1_row, w2, b2_col)
    return out_flat.reshape(B, C, H, W)


def ca_layer_ref(x, params):
    """Plain-JAX mirror of the PyTorch forward (for correctness checking)."""
    pooled = x.mean(axis=(2, 3))                            # (B, C)
    h = pooled @ params["w1"].T + params["b1"]              # (B, mid)   (no activation)
    z = h @ params["w2"].T + params["b2"]                   # (B, C)
    s = jax.nn.sigmoid(z)[:, :, None, None]                 # (B, C, 1, 1)
    return x * s


if __name__ == "__main__":
    B, C, H, W = 2, 64, 16, 16          # in_ch=64, reduction=16 -> mid=4
    reduction = 16
    mid = C // reduction

    key = jax.random.PRNGKey(0)
    kx, k1, k2, k3, k4 = jax.random.split(key, 5)
    x = jax.random.normal(kx, (B, C, H, W), dtype=jnp.float32)

    params = {
        "w1": 0.1 * jax.random.normal(k1, (mid, C), dtype=jnp.float32),
        "b1": 0.01 * jax.random.normal(k2, (mid,), dtype=jnp.float32),
        "w2": 0.1 * jax.random.normal(k3, (C, mid), dtype=jnp.float32),
        "b2": 0.01 * jax.random.normal(k4, (C,), dtype=jnp.float32),
    }

    out = ca_layer_pallas(x, params)
    out = jax.block_until_ready(out)

    ref = ca_layer_ref(x, params)
    assert out.shape == (B, C, H, W)
    assert jnp.allclose(out, ref, atol=1e-4, rtol=1e-4), "mismatch vs JAX reference"

    print("KERNEL_OK")
</pallas_src>

<mosaic_0001>
module attributes {stable_mosaic.version = 11 : i64} {
  func.func @_ca_layer_kernel(%arg0: i32, %arg1: memref<1x64x256xf32, #tpu.memory_space<vmem>>, %arg2: memref<64x4xf32, #tpu.memory_space<vmem>>, %arg3: memref<1x4xf32, #tpu.memory_space<vmem>>, %arg4: memref<64x4xf32, #tpu.memory_space<vmem>>, %arg5: memref<64x1xf32, #tpu.memory_space<vmem>>, %arg6: memref<1x64x256xf32, #tpu.memory_space<vmem>>) attributes {dimension_semantics = [#tpu.dimension_semantics<parallel>], iteration_bounds = array<i64: 2>, scalar_prefetch = 0 : i64, scratch_operands = 0 : i64, tpu.core_type = #tpu.core_type<tc>, window_params = [{transform_indices = @transform_0, window_bounds = array<i64: 1, 64, 256>}, {pipeline_mode = #tpu.pipeline_mode<synchronous>, transform_indices = @transform_1, window_bounds = array<i64: 64, 4>}, {pipeline_mode = #tpu.pipeline_mode<synchronous>, transform_indices = @transform_2, window_bounds = array<i64: 1, 4>}, {pipeline_mode = #tpu.pipeline_mode<synchronous>, transform_indices = @transform_3, window_bounds = array<i64: 64, 4>}, {pipeline_mode = #tpu.pipeline_mode<synchronous>, transform_indices = @transform_4, window_bounds = array<i64: 64, 1>}, {transform_indices = @transform_5, window_bounds = array<i64: 1, 64, 256>}]} {
    %c0 = arith.constant 0 : index
    %c0_0 = arith.constant 0 : index
    %c0_1 = arith.constant 0 : index
    %0 = vector.load %arg1[%c0, %c0_0, %c0_1] : memref<1x64x256xf32, #tpu.memory_space<vmem>>, vector<1x64x256xf32>
    %1 = vector.shape_cast %0 : vector<1x64x256xf32> to vector<64x256xf32>
    %cst = arith.constant dense<0.000000e+00> : vector<64xf32>
    %2 = vector.multi_reduction <add>, %1, %cst [1] : vector<64x256xf32> to vector<64xf32>
    %3 = vector.shape_cast %2 : vector<64xf32> to vector<64x1xf32>
    %cst_2 = arith.constant 3.906250e-03 : f32
    %4 = vector.broadcast %cst_2 : f32 to vector<64x1xf32>
    %5 = arith.mulf %3, %4 : vector<64x1xf32>
    %c0_3 = arith.constant 0 : index
    %c0_4 = arith.constant 0 : index
    %6 = vector.load %arg2[%c0_3, %c0_4] : memref<64x4xf32, #tpu.memory_space<vmem>>, vector<64x4xf32>
    %7 = vector.broadcast %5 : vector<64x1xf32> to vector<64x4xf32>
    %8 = arith.mulf %6, %7 : vector<64x4xf32>
    %cst_5 = arith.constant dense<0.000000e+00> : vector<4xf32>
    %9 = vector.multi_reduction <add>, %8, %cst_5 [0] : vector<64x4xf32> to vector<4xf32>
    %10 = vector.shape_cast %9 : vector<4xf32> to vector<1x4xf32>
    %c0_6 = arith.constant 0 : index
    %c0_7 = arith.constant 0 : index
    %11 = vector.load %arg3[%c0_6, %c0_7] : memref<1x4xf32, #tpu.memory_space<vmem>>, vector<1x4xf32>
    %12 = arith.addf %10, %11 : vector<1x4xf32>
    %c0_8 = arith.constant 0 : index
    %c0_9 = arith.constant 0 : index
    %13 = vector.load %arg4[%c0_8, %c0_9] : memref<64x4xf32, #tpu.memory_space<vmem>>, vector<64x4xf32>
    %14 = vector.broadcast %12 : vector<1x4xf32> to vector<64x4xf32>
    %15 = arith.mulf %13, %14 : vector<64x4xf32>
    %cst_10 = arith.constant dense<0.000000e+00> : vector<64xf32>
    %16 = vector.multi_reduction <add>, %15, %cst_10 [1] : vector<64x4xf32> to vector<64xf32>
    %17 = vector.shape_cast %16 : vector<64xf32> to vector<64x1xf32>
    %c0_11 = arith.constant 0 : index
    %c0_12 = arith.constant 0 : index
    %18 = vector.load %arg5[%c0_11, %c0_12] : memref<64x1xf32, #tpu.memory_space<vmem>>, vector<64x1xf32>
    %19 = arith.addf %17, %18 : vector<64x1xf32>
    %cst_13 = arith.constant 0.000000e+00 : f32
    %20 = vector.broadcast %cst_13 : f32 to vector<64x1xf32>
    %21 = arith.subf %20, %19 : vector<64x1xf32>
    %22 = math.exp %21 : vector<64x1xf32>
    %cst_14 = arith.constant 1.000000e+00 : f32
    %23 = vector.broadcast %cst_14 : f32 to vector<64x1xf32>
    %24 = arith.addf %23, %22 : vector<64x1xf32>
    %cst_15 = arith.constant 1.000000e+00 : f32
    %25 = vector.broadcast %cst_15 : f32 to vector<64x1xf32>
    %26 = arith.divf %25, %24 : vector<64x1xf32>
    %27 = vector.broadcast %26 : vector<64x1xf32> to vector<64x256xf32>
    %28 = arith.mulf %1, %27 : vector<64x256xf32>
    %c0_16 = arith.constant 0 : index
    %c0_17 = arith.constant 0 : index
    %c0_18 = arith.constant 0 : index
    %29 = vector.load %arg6[%c0_16, %c0_17, %c0_18] : memref<1x64x256xf32, #tpu.memory_space<vmem>>, vector<1x64x256xf32>
    %30 = vector.shape_cast %29 : vector<1x64x256xf32> to vector<64x256xf32>
    %31 = vector.shape_cast %28 : vector<64x256xf32> to vector<1x64x256xf32>
    tpu.vector_store %arg6[%c0_16, %c0_17, %c0_18], %31 {strides = array<i32>} : memref<1x64x256xf32, #tpu.memory_space<vmem>>, vector<1x64x256xf32>,
    return
  }
  func.func @transform_0(%arg0: i32) -> (i32, i32, i32) {
    %c0_i32 = arith.constant 0 : i32
    %c0_i32_0 = arith.constant 0 : i32
    %c0_i32_1 = arith.constant 0 : i32
    return %arg0, %c0_i32, %c0_i32_0 : i32, i32, i32
  }
  func.func @transform_1(%arg0: i32) -> (i32, i32) {
    %c0_i32 = arith.constant 0 : i32
    %c0_i32_0 = arith.constant 0 : i32
    %c0_i32_1 = arith.constant 0 : i32
    return %c0_i32, %c0_i32_0 : i32, i32
  }
  func.func @transform_2(%arg0: i32) -> (i32, i32) {
    %c0_i32 = arith.constant 0 : i32
    %c0_i32_0 = arith.constant 0 : i32
    %c0_i32_1 = arith.constant 0 : i32
    return %c0_i32, %c0_i32_0 : i32, i32
  }
  func.func @transform_3(%arg0: i32) -> (i32, i32) {
    %c0_i32 = arith.constant 0 : i32
    %c0_i32_0 = arith.constant 0 : i32
    %c0_i32_1 = arith.constant 0 : i32
    return %c0_i32, %c0_i32_0 : i32, i32
  }
  func.func @transform_4(%arg0: i32) -> (i32, i32) {
    %c0_i32 = arith.constant 0 : i32
    %c0_i32_0 = arith.constant 0 : i32
    %c0_i32_1 = arith.constant 0 : i32
    return %c0_i32, %c0_i32_0 : i32, i32
  }
  func.func @transform_5(%arg0: i32) -> (i32, i32, i32) {
    %c0_i32 = arith.constant 0 : i32
    %c0_i32_0 = arith.constant 0 : i32
    %c0_i32_1 = arith.constant 0 : i32
    return %arg0, %c0_i32, %c0_i32_0 : i32, i32, i32
  }
}

</mosaic_0001>

<bundles_post_ra>
// kernel: tpu_custom_call.1
= control target key start
LH: loop header
LB: loop body
LE: loop exit
PB: predicated region body
PF: predicated region fallthrough
CT: control target
= control target key end

     0   :  { %10 = vsyncpa [#allocation3], 0  ;;  %s1174_s0 = inlined_call_operand.hbm [shape: f32[2,64,256], index: 0, kind: input, shape index: {}]   ;;  %s1175_s1 = inlined_call_operand.vmem [shape: f32[64,4], index: 1, kind: input, shape index: {}]   ;;  %s1176_s2 = inlined_call_operand.vmem [shape: f32[1,4], index: 2, kind: input, shape index: {}]   ;;  %s1177_s3 = inlined_call_operand.vmem [shape: f32[64,4], index: 3, kind: input, shape index: {}]   ;;  %s1178_s4 = inlined_call_operand.vmem [shape: f32[64,1], index: 4, kind: input, shape index: {}]   ;;  %s1179_s5 = inlined_call_operand.hbm [shape: f32[2,64,256], index: 5, kind: output, shape index: {}]  }
   0x1   :  { %12 = vsyncpa [#allocation3 + $0x1], 0 }
   0x2   :  { %13 = vsyncpa [#allocation4], 0 }
   0x3   :  { %15 = vsyncpa [#allocation4 + $0x1], 0  ;;  %s834_s18 = smov 0   ;;  %s836_s19 = smov 0  }
   0x4   :  { %s838_s20 = smov 0   ;;  %s840_s21 = smov 0  }
   0x5 LB: > { %s855_s22 = sadd.s32 4294967295, %s795_s21   ;;  %s598_s23 = sadd.s32 4294967294, %s795_s21   ;;  %s795_s21 = sphi %s840_s21, %s1192_s21   ;;  %s791_s20 = sphi %s838_s20, %s1191_s20   ;;  %s787_s19 = sphi %s836_s19, %s1190_s19   ;;  %s783_s18 = sphi %s834_s18, %s1189_s18  }
   0x6   : > { %s859_s24 = sadd.s32 1, %s795_s21   ;;  %s28_s25 = sadd.s32 1, %s791_s20 }
   0x7   : > { %s25_s26 = ssub.s32 %s795_s21, %s859_s24  ;;  %p35_p0 = scmp.ne.s32.totalorder %s791_s20, %s787_s19 }
   0x8   : > { %p26_p1 = scmp.eq.s32.totalorder %s25_s26, 0  ;;  %p36_p2 = scmp.eq.s32.totalorder %s795_s21, 0 }
   0x9   : > { %p41_p3 = scmp.ne.s32.totalorder %s787_s19, %s783_s18  ;;  %p42_p4 = scmp.eq.s32.totalorder %s855_s22, 0 }
   0xa   : > { %s871_s27 = scalar_select %p26_p1, %s791_s20, %s28_s25  }
   0xb   : > { %p873_p5 = por %p36_p2, %p35_p0  ;;  %p877_p6 = por %p42_p4, %p41_p3 }
   0xc   : > { %p149_p7 = scmp.eq.s32.totalorder %s855_s22, 1  ;;  %p155_p8 = scmp.eq.s32.totalorder %s598_s23, 1 }
   0xd   : > { %p626_p10 = scmp.lt.s32.totalorder %s795_s21, 2  ;;  %s187_s7 = sand.u32 1, %s791_s20  }
   0xe   : > { %p884_p11 = por %p149_p7, %p35_p0  ;;  %p888_p12 = por %p155_p8, %p41_p3 }
   0xf   : > { %s612_s8 = sshll.u32 %s795_s21, 11  ;;  %s601_s9 = sshll.u32 %s187_s7, 7 }
  0x10   : > { %s1183_s30 = scalar_select %p884_p11, 1, 0 }
  0x11   : > { %s1184_s6 = scalar_select %p888_p12, 1, 0 }
  0x12   : > { %s897_s12 = scalar_lea.hbm %s1174_s0, %s612_s8  ;;  %s191_s13 = scalar_lea.vmem [#allocation2], %s601_s9 }
  0x13   : > { %s198_s14 = sshll.u32 %s191_s13, 4  ;;  %p901_p13 = pnand %p626_p10, %p873_p5  ;;  %s905_s14 = int_to_ptr.vmem [resolvable:$true] %s198_s14 }
  0x14   : > { %s907_s16 = scalar_lea.sflag [#allocation3], %s187_s7  ;;  %s699_s17 = scalar_lea.hbm %s897_s12, 2048 }
  0x15   : > { %p700_p0 = scmp.ne.s32.totalorder %s897_s12, %s699_s17  ;;  %p701_p1 = pneg %p901_p13 }
  0x16   : > { %s704_s26 = scalar_lea.hbm %s1174_s0, 4096  ;;  %p705_p4 = scmp.lt.u32.totalorder %s897_s12, %s1174_s0 }
  0x17   : > { %p702_p2 = pnand %p701_p1, %p700_p0  ;;  %p706_p5 = scmp.lt.u32.totalorder %s704_s26, %s699_s17 }
  0x18   : > { %p708_p8 = scmp.lt.u32.totalorder %s699_s17, %s897_s12 }
  0x19   : > { %p703_p3 = pneg %p702_p2  ;;  %p707_p7 = por %p706_p5, %p705_p4 }
  0x1b   : > { %p709_p10 = por %p708_p8, %p707_p7 }
  0x1d   : > { %p710_p9 = pnand %p709_p10, %p703_p3 }
  0x1f   : > { %713 = shalt.err (!%p710_p9)
}
  0x20   : > { %s714_s7 = scalar_lea.vmem %s905_s14, 2048  ;;  %s797_s9 = smov [#allocation2]  }
  0x21   : > { %p715_p0 = scmp.ne.s32.totalorder %s905_s14, %s714_s7  ;;  %s719_s10 = sshll.u32 %s797_s9, 4  ;;  %s720_s10 = int_to_ptr.vmem [resolvable:$false] %s719_s10 }
  0x22   : > { %s721_s11 = scalar_lea.vmem %s720_s10, 4096  ;;  %p722_p11 = scmp.lt.s32.totalorder %s905_s14, %s720_s10 }
  0x23   : > { %p717_p2 = pnand %p715_p0, %p701_p1  ;;  %p723_p4 = scmp.lt.s32.totalorder %s721_s11, %s714_s7 }
  0x25   : > { %p718_p12 = pneg %p717_p2  ;;  %p724_p5 = por %p723_p4, %p722_p11 }
  0x27   : > { %p725_p7 = pnand %p724_p5, %p718_p12 }
  0x29   : > { %728 = shalt.err (!%p725_p7)
}
  0x2a   : > { %s798_s13 = smov 256   ;;  %s799_s17 = smov 16  }
  0x2b   : > { %621 = dma.hbm_to_vmem [thread:$0]  (!%p901_p13), %s897_s12, 2048, %s905_s14, %s907_s16, %s798_s13, %s798_s13, %s799_s17  }
  0x2c   : > { %p604_p9 = scmp.ge.s32.totalorder %s795_s21, 1  ;;  %p206_p1 = scmp.lt.s32.totalorder %s795_s21, 3 }
  0x2e   : > { %p207_p3 = pnand %p604_p9, %p206_p1 }
  0x2f   : > { %s938_s23 = sand.u32 (!%p207_p3), 1, %s787_s19  }
  0x30   : > { %210 = sbr.rel (%p207_p3) target bundleno = 585 (0x249), region = 40  ;;  %s605_s25 = sshll.u32 (!%p207_p3), %s938_s23, 7 }
  0x31   : > { %s213_s26 = scalar_lea.sflag (!%p207_p3), [#allocation3], %s938_s23  ;;  %s216_s28 = scalar_lea.vmem (!%p207_p3), [#allocation2], %s605_s25 }
  0x37   : > { %774 = dma.done.wait (%p877_p6), %s213_s26, 2048  }
  0x38   : > { %776 = vsyncadd (%p877_p6), %s213_s26, 4294965248  ;;  %v948_v0 = vld [vmem:[%s216_s28] sm:$0xff]  ;;  %v950_v1 = vld [vmem:[%s216_s28 + $0x8] sm:$0xff]  ;;  %vm307_vm0 = vcmask 31744   ;;  %s1093_s10 = scalar_lea.vmem [#allocation5], %s605_s25  ;;  %s613_s25 = sshll.u32 %s855_s22, 11 }
  0x39   : > { %v952_v2 = vld [vmem:[%s216_s28 + $0x20] sm:$0xff]  ;;  %v259_v3 = vadd.f32 %v950_v1, %v948_v0  ;;  %v956_v4 = vld [vmem:[%s216_s28 + $0x28] sm:$0xff]  ;;  %v958_v5 = vld [vmem:[%s216_s28 + $0x10] sm:$0xff]  ;;  %s525_s11 = sshll.u32 %s1093_s10, 4  ;;  %s1124_s26 = scalar_lea.hbm %s1179_s5, %s613_s25  ;;  %s1126_s11 = int_to_ptr.vmem [resolvable:$true] %s525_s11 }
  0x3a   : > { %v960_v6 = vld [vmem:[%s216_s28 + $0x18] sm:$0xff]  ;;  %v265_v7 = vadd.f32 %v956_v4, %v952_v2  ;;  %v964_v8 = vld [vmem:[%s216_s28 + $0x30] sm:$0xff]  ;;  %v972_v12 = vld [vmem:[%s216_s28 + $0x40] sm:$0xff]  ;;  %s512_s22 = scalar_lea.sflag [#allocation4], %s938_s23  ;;  %p1186_p11 = scmp.ne.s32.totalorder %s1183_s30, 0 }
  0x3b   : > { %v966_v9 = vld [vmem:[%s216_s28 + $0x38] sm:$0xff]  ;;  %260 = vadd.xlane.f32.xlu0 %v259_v3  ;;  %v262_v10 = vadd.f32 %v960_v6, %v958_v5  ;;  %v974_v13 = vld [vmem:[%s216_s28 + $0x48] sm:$0xff]  ;;  %v976_v14 = vld [vmem:[%s216_s28 + $0x50] sm:$0xff]  ;;  %s801_s29 = smov [#allocation5]  }
  0x3c   : > { %266 = vadd.xlane.f32.xlu1 %v265_v7  ;;  %v268_v11 = vadd.f32 %v966_v9, %v964_v8  ;;  %v978_v15 = vld [vmem:[%s216_s28 + $0x58] sm:$0xff]  ;;  %v271_v16 = vadd.f32 %v974_v13, %v972_v12  ;;  %v984_v18 = vld [vmem:[%s216_s28 + $0x60] sm:$0xff]  ;;  %v986_v19 = vld [vmem:[%s216_s28 + $0x68] sm:$0xff]  ;;  %s733_s12 = sshll.u32 %s801_s29, 4  ;;  %s734_s12 = int_to_ptr.vmem [resolvable:$false] %s733_s12 }
  0x3d   : > { %v274_v17 = vadd.f32 %v978_v15, %v976_v14  ;;  %v988_v20 = vld [vmem:[%s216_s28 + $0x70] sm:$0xff]  ;;  %v990_v21 = vld [vmem:[%s216_s28 + $0x78] sm:$0xff]  ;;  %v277_v22 = vadd.f32 %v986_v19, %v984_v18  ;;  %v291_v27 = vld [vmem:[%s1175_s1] sm:$0xff]  ;;  %s729_s28 = scalar_lea.vmem %s1126_s11, 2048  ;;  %s735_s14 = scalar_lea.vmem %s734_s12, 4096 }
  0x3e   : > { %v280_v23 = vadd.f32 %v990_v21, %v988_v20  ;;  %v293_v29 = vld [vmem:[%s1175_s1 + $0x10] sm:$0xff]  ;;  %v292_v30 = vld [vmem:[%s1175_s1 + $0x8] sm:$0xff]  ;;  %v294_v34 = vld [vmem:[%s1175_s1 + $0x18] sm:$0xff]  ;;  %p730_p6 = scmp.ne.s32.totalorder %s1126_s11, %s729_s28  ;;  %p736_p8 = scmp.lt.s32.totalorder %s1126_s11, %s734_s12 }
  0x3f   : > { %263 = vadd.xlane.f32.xlu0 %v262_v10  ;;  %v295_v40 = vld [vmem:[%s1175_s1 + $0x20] sm:$0xff]  ;;  %v296_v45 = vld [vmem:[%s1175_s1 + $0x28] sm:$0xff]  ;;  %v297_v54 = vld [vmem:[%s1175_s1 + $0x30] sm:$0xff]  ;;  %p737_p10 = scmp.lt.s32.totalorder %s735_s14, %s729_s28 }
  0x40   : > { %269 = vadd.xlane.f32.xlu1 %v268_v11  ;;  %v298_v58 = vld [vmem:[%s1175_s1 + $0x38] sm:$0xff]  ;;  %p731_p12 = pnand %p730_p6, %p1186_p11 }
  0x41   : > { %p738_p0 = por %p737_p10, %p736_p8 }
  0x42   : > { %p732_p13 = pneg %p731_p12 }
  0x43   : > { %272 = vadd.xlane.f32.xlu0 %v271_v16 }
  0x44   : > { %275 = vadd.xlane.f32.xlu1 %v274_v17  ;;  %p739_p2 = pnand %p738_p0, %p732_p13 }
  0x47   : > { %278 = vadd.xlane.f32.xlu0 %v277_v22 }
  0x48   : > { %281 = vadd.xlane.f32.xlu1 %v280_v23 }
  0xc8   : > { %v261_v24 = vpop.xlane.xlu0 %260 }
  0xc9   : > { %v283_v25 = vmul.f32 0.00390625, %v261_v24  ;;  %v267_v26 = vpop.xlane.xlu1 %266  ;;  %v339_v24 = vlaneseq }
  0xca   : > { %v285_v28 = vmul.f32 0.00390625, %v267_v26 }
  0xcb   : > { %v299_v32 = vmul.f32 %v291_v27, %v283_v25  ;;  %v340_v27 = vshrl.u32 %v339_v24, 7 }
  0xcc   : > { %v264_v31 = vpop.xlane.xlu0 %263  ;;  %v301_v37 = vmul.f32 %v293_v29, %v285_v28 }
  0xcd   : > { %v284_v33 = vmul.f32 0.00390625, %v264_v31  ;;  %v270_v35 = vpop.xlane.xlu1 %269  ;;  %v308_v42 = vsel %vm307_vm0, %v299_v32, 0.0  ;;  %v341_v31 = vsub.s32 0, %v340_v27 }
  0xce   : > { %v286_v36 = vmul.f32 0.00390625, %v270_v35  ;;  %v311_v49 = vsel %vm307_vm0, %v301_v37, 0.0  ;;  %v331_v35 = vld [vmem:[%s1177_s3] sm:$0xff]  ;;  %v334_v37 = vld [vmem:[%s1177_s3 + $0x18] sm:$0xff] }
  0xcf   : > { %v300_v38 = vmul.f32 %v292_v30, %v284_v33  ;;  %v329_v30 = vld [vmem:[%s1176_s2] sm:$0x1] }
  0xd0   : > { %v302_v39 = vmul.f32 %v294_v34, %v286_v36  ;;  %v273_v41 = vpop.xlane.xlu0 %272  ;;  %v332_v34 = vld [vmem:[%s1177_s3 + $0x8] sm:$0xff] }
  0xd1   : > { %v309_v43 = vsel %vm307_vm0, %v300_v38, 0.0  ;;  %v287_v44 = vmul.f32 0.00390625, %v273_v41  ;;  %v276_v46 = vpop.xlane.xlu1 %275  ;;  %v333_v38 = vld [vmem:[%s1177_s3 + $0x10] sm:$0xff] }
  0xd2   : > { %v310_v47 = vadd.f32 %v309_v43, %v308_v42  ;;  %v288_v48 = vmul.f32 0.00390625, %v276_v46  ;;  %v313_v50 = vsel %vm307_vm0, %v302_v39, 0.0  ;;  %v335_v46 = vld [vmem:[%s1177_s3 + $0x20] sm:$0xff] }
  0xd3   : > { %v303_v51 = vmul.f32 %v295_v40, %v287_v44 }
  0xd4   : > { %v312_v52 = vadd.f32 %v311_v49, %v310_v47  ;;  %v304_v53 = vmul.f32 %v296_v45, %v288_v48  ;;  %v279_v55 = vpop.xlane.xlu0 %278  ;;  %v336_v45 = vld [vmem:[%s1177_s3 + $0x28] sm:$0xff] }
  0xd5   : > { %v315_v56 = vsel %vm307_vm0, %v303_v51, 0.0  ;;  %v289_v57 = vmul.f32 0.00390625, %v279_v55  ;;  %v282_v59 = vpop.xlane.xlu1 %281  ;;  %v338_v51 = vld [vmem:[%s1177_s3 + $0x38] sm:$0xff] }
  0xd6   : > { %v314_v60 = vadd.f32 %v313_v50, %v312_v52  ;;  %v290_v61 = vmul.f32 0.00390625, %v282_v59  ;;  %v317_v62 = vsel %vm307_vm0, %v304_v53, 0.0  ;;  %v337_v52 = vld [vmem:[%s1177_s3 + $0x30] sm:$0xff]  ;;  %v800_v59 = vmov 0  }
  0xd7   : > { %v305_v63 = vmul.f32 %v297_v54, %v289_v57  ;;  %666 = vset.pattern.permute.xlu1 %v800_v59  ;;  %665 = vset.pattern.permute.xlu0 %v800_v59 }
  0xd8   : > { %v316_v3 = vadd.f32 %v315_v56, %v314_v60  ;;  %v306_v7 = vmul.f32 %v298_v58, %v290_v61  ;;  %v376_v60 = vld [vmem:[%s1178_s4 + $0x8] sm:$0xff]  ;;  %v375_v61 = vld [vmem:[%s1178_s4] sm:$0xff] }
  0xd9   : > { %v319_v10 = vsel %vm307_vm0, %v305_v63, 0.0 }
  0xda   : > { %v318_v11 = vadd.f32 %v317_v62, %v316_v3  ;;  %v321_v16 = vsel %vm307_vm0, %v306_v7, 0.0 }
  0xdc   : > { %v320_v17 = vadd.f32 %v319_v10, %v318_v11  ;;  %v378_v10 = vld [vmem:[%s1178_s4 + $0x18] sm:$0xff]  ;;  %v377_v11 = vld [vmem:[%s1178_s4 + $0x10] sm:$0xff] }
  0xde   : > { %v322_v22 = vadd.f32 %v321_v16, %v320_v17 }
  0xe0   : > { %v323_v23 = vrot.slane %v322_v22, 4 }
  0xe2   : > { %v324_v25 = vadd.f32 %v323_v23, %v322_v22 }
  0xe4   : > { %v325_v26 = vrot.slane %v324_v25, 2 }
  0xe6   : > { %v326_v28 = vadd.f32 %v325_v26, %v324_v25 }
  0xe8   : > { %v327_v29 = vrot.slane %v326_v28, 1 }
  0xea   : > { %v328_v32 = vadd.f32 %v327_v29, %v326_v28  ;;  %v380_v28 = vld [vmem:[%s1178_s4 + $0x28] sm:$0xff]  ;;  %v379_v29 = vld [vmem:[%s1178_s4 + $0x20] sm:$0xff] }
  0xec   : > { %v330_v33 = vadd.f32 %v329_v30, %v328_v32 }
  0xee   : > { %v342_v36 = vrot.slane %v330_v33, %v341_v31 }
  0xf0   : > { %v344_v39 = vmul.f32 %v342_v36, %v332_v34  ;;  %v343_v40 = vmul.f32 %v342_v36, %v331_v35  ;;  %v346_v43 = vmul.f32 %v342_v36, %v334_v37  ;;  %v345_v44 = vmul.f32 %v342_v36, %v333_v38  ;;  %v381_v38 = vld [vmem:[%s1178_s4 + $0x30] sm:$0xff] }
  0xf1   : > { %v348_v49 = vmul.f32 %v342_v36, %v336_v45  ;;  %v347_v50 = vmul.f32 %v342_v36, %v335_v46  ;;  %v350_v55 = vmul.f32 %v342_v36, %v338_v51  ;;  %v349_v56 = vmul.f32 %v342_v36, %v337_v52 }
  0xf2   : > { %v354_v41 = vsel %vm307_vm0, %v344_v39, 0.0  ;;  %v351_v42 = vsel %vm307_vm0, %v343_v40, 0.0  ;;  %v360_v47 = vsel %vm307_vm0, %v346_v43, 0.0  ;;  %v357_v48 = vsel %vm307_vm0, %v345_v44, 0.0  ;;  %v382_v43 = vld [vmem:[%s1178_s4 + $0x38] sm:$0xff] }
  0xf3   : > { %355 = vadd.xlane.f32.xlu1 %v354_v41  ;;  %352 = vadd.xlane.f32.xlu0 %v351_v42  ;;  %v366_v53 = vsel %vm307_vm0, %v348_v49, 0.0  ;;  %v363_v54 = vsel %vm307_vm0, %v347_v50, 0.0  ;;  %v372_v57 = vsel %vm307_vm0, %v350_v55, 0.0  ;;  %v369_v58 = vsel %vm307_vm0, %v349_v56, 0.0 }
  0xf7   : > { %361 = vadd.xlane.f32.xlu1 %v360_v47  ;;  %358 = vadd.xlane.f32.xlu0 %v357_v48 }
  0xfb   : > { %367 = vadd.xlane.f32.xlu1 %v366_v53  ;;  %364 = vadd.xlane.f32.xlu0 %v363_v54 }
  0xff   : > { %373 = vadd.xlane.f32.xlu1 %v372_v57  ;;  %370 = vadd.xlane.f32.xlu0 %v369_v58 }
 0x180   : > { %v356_v62 = vpop.xlane.xlu1 %355  ;;  %v353_v63 = vpop.xlane.xlu0 %352 }
 0x181   : > { %v384_v3 = vadd.f32 %v376_v60, %v356_v62  ;;  %v383_v7 = vadd.f32 %v375_v61, %v353_v63 }
 0x183   : > { %v392_v16 = vsub.f32 0.0, %v384_v3  ;;  %v391_v17 = vsub.f32 0.0, %v383_v7 }
 0x184   : > { %v362_v22 = vpop.xlane.xlu1 %361  ;;  %v359_v23 = vpop.xlane.xlu0 %358 }
 0x185   : > { %v401_v24 = vmul.f32 1.442695, %v392_v16  ;;  %v399_v25 = vmul.f32 1.442695, %v391_v17  ;;  %v386_v26 = vadd.f32 %v378_v10, %v362_v22  ;;  %v385_v27 = vadd.f32 %v377_v11, %v359_v23 }
 0x187   : > { %667 = vpow2.f32 %v401_v24  ;;  %v394_v30 = vsub.f32 0.0, %v386_v26  ;;  %v393_v31 = vsub.f32 0.0, %v385_v27 }
 0x188   : > { %669 = vpow2.f32 %v399_v25  ;;  %v368_v32 = vpop.xlane.xlu1 %367  ;;  %v365_v33 = vpop.xlane.xlu0 %364 }
 0x189   : > { %v405_v34 = vmul.f32 1.442695, %v394_v30  ;;  %v403_v35 = vmul.f32 1.442695, %v393_v31  ;;  %v388_v36 = vadd.f32 %v380_v28, %v368_v32  ;;  %v387_v37 = vadd.f32 %v379_v29, %v365_v33 }
 0x18b   : > { %671 = vpow2.f32 %v405_v34  ;;  %v396_v39 = vsub.f32 0.0, %v388_v36  ;;  %v395_v40 = vsub.f32 0.0, %v387_v37 }
 0x18c   : > { %673 = vpow2.f32 %v403_v35  ;;  %v371_v41 = vpop.xlane.xlu0 %370  ;;  %v374_v44 = vpop.xlane.xlu1 %373 }
 0x18d   : > { %v407_v42 = vmul.f32 1.442695, %v395_v40  ;;  %v389_v45 = vadd.f32 %v381_v38, %v371_v41  ;;  %v409_v46 = vmul.f32 1.442695, %v396_v39  ;;  %v390_v47 = vadd.f32 %v382_v43, %v374_v44 }
 0x18f   : > { %675 = vpow2.f32 %v407_v42  ;;  %v397_v48 = vsub.f32 0.0, %v389_v45  ;;  %v398_v53 = vsub.f32 0.0, %v390_v47 }
 0x190   : > { %677 = vpow2.f32 %v409_v46 }
 0x191   : > { %v668_v49 = vpop.eup %667  ;;  %v411_v54 = vmul.f32 1.442695, %v397_v48  ;;  %v413_v58 = vmul.f32 1.442695, %v398_v53 }
 0x192   : > { %v670_v50 = vpop.eup %669  ;;  %v416_v51 = vadd.f32 1.0, %v668_v49 }
 0x193   : > { %v415_v52 = vadd.f32 1.0, %v670_v50 }
 0x194   : > { %679 = vrcp.f32 %v416_v51 }
 0x195   : > { %v672_v55 = vpop.eup %671  ;;  %681 = vrcp.f32 %v415_v52 }
 0x196   : > { %v674_v56 = vpop.eup %673  ;;  %683 = vpow2.f32 %v411_v54  ;;  %v418_v59 = vadd.f32 1.0, %v672_v55 }
 0x197   : > { %v417_v57 = vadd.f32 1.0, %v674_v56 }
 0x199   : > { %685 = vrcp.f32 %v417_v57  ;;  %v676_v60 = vpop.eup %675 }
 0x19a   : > { %687 = vpow2.f32 %v413_v58  ;;  %v678_v61 = vpop.eup %677  ;;  %v419_v62 = vadd.f32 1.0, %v676_v60 }
 0x19b   : > { %689 = vrcp.f32 %v418_v59  ;;  %v420_v7 = vadd.f32 1.0, %v678_v61 }
 0x19c   : > { %691 = vrcp.f32 %v419_v62 }
 0x19d   : > { %693 = vrcp.f32 %v420_v7 }
 0x19e   : > { %v680_v63 = vpop.eup %679 }
 0x19f   : > { %v682_v3 = vpop.eup %681  ;;  %446 = vperm.xlu1 %666, %v680_v63  }
 0x1a0   : > { %441 = vperm.xlu0 %665, %v682_v3   ;;  %v684_v10 = vpop.eup %683 }
 0x1a1   : > { %v421_v16 = vadd.f32 1.0, %v684_v10 }
 0x1a3   : > { %v686_v11 = vpop.eup %685  ;;  %695 = vrcp.f32 %v421_v16 }
 0x1a4   : > { %451 = vperm.xlu1 %666, %v686_v11   ;;  %v688_v17 = vpop.eup %687 }
 0x1a5   : > { %v690_v22 = vpop.eup %689  ;;  %v422_v23 = vadd.f32 1.0, %v688_v17 }
 0x1a6   : > { %v692_v24 = vpop.eup %691 }
 0x1a7   : > { %697 = vrcp.f32 %v422_v23  ;;  %v694_v25 = vpop.eup %693 }
 0x1a8   : > { %456 = vperm.xlu1 %666, %v690_v22  }
 0x1ac   : > { %461 = vperm.xlu1 %666, %v692_v24  }
 0x1ad   : > { %v696_v26 = vpop.eup %695 }
 0x1b0   : > { %466 = vperm.xlu1 %666, %v694_v25  }
 0x1b1   : > { %v698_v27 = vpop.eup %697 }
 0x1b4   : > { %471 = vperm.xlu1 %666, %v696_v26  }
 0x1b8   : > { %476 = vperm.xlu1 %666, %v698_v27  }
 0x21e   : > { %v447_v28 = vpop.permute.xlu1 %446 }
 0x21f   : > { %v481_v29 = vmul.f32 %v447_v28, %v958_v5  ;;  %v482_v30 = vmul.f32 %v447_v28, %v960_v6  ;;  %v442_v31 = vpop.permute.xlu0 %441 }
 0x220   : > { %v479_v32 = vmul.f32 %v442_v31, %v948_v0  ;;  %v480_v33 = vmul.f32 %v442_v31, %v950_v1 }
 0x221   : > { %497 = vst [vmem:[%s1093_s10 + $0x10] sm:$0xff] %v481_v29  ;;  %498 = vst [vmem:[%s1093_s10 + $0x18] sm:$0xff] %v482_v30 }
 0x222   : > { %495 = vst [vmem:[%s1093_s10] sm:$0xff] %v479_v32  ;;  %496 = vst [vmem:[%s1093_s10 + $0x8] sm:$0xff] %v480_v33 }
 0x223   : > { %v452_v0 = vpop.permute.xlu1 %451 }
 0x224   : > { %v483_v1 = vmul.f32 %v452_v0, %v952_v2  ;;  %v484_v5 = vmul.f32 %v452_v0, %v956_v4 }
 0x226   : > { %499 = vst [vmem:[%s1093_s10 + $0x20] sm:$0xff] %v483_v1  ;;  %500 = vst [vmem:[%s1093_s10 + $0x28] sm:$0xff] %v484_v5 }
 0x227   : > { %v457_v6 = vpop.permute.xlu1 %456 }
 0x228   : > { %v485_v34 = vmul.f32 %v457_v6, %v964_v8  ;;  %v486_v35 = vmul.f32 %v457_v6, %v966_v9 }
 0x22a   : > { %501 = vst [vmem:[%s1093_s10 + $0x30] sm:$0xff] %v485_v34  ;;  %502 = vst [vmem:[%s1093_s10 + $0x38] sm:$0xff] %v486_v35 }
 0x22b   : > { %v462_v36 = vpop.permute.xlu1 %461 }
 0x22c   : > { %v487_v2 = vmul.f32 %v462_v36, %v972_v12  ;;  %v488_v4 = vmul.f32 %v462_v36, %v974_v13 }
 0x22e   : > { %503 = vst [vmem:[%s1093_s10 + $0x40] sm:$0xff] %v487_v2  ;;  %504 = vst [vmem:[%s1093_s10 + $0x48] sm:$0xff] %v488_v4 }
 0x22f   : > { %v467_v37 = vpop.permute.xlu1 %466 }
 0x230   : > { %v489_v38 = vmul.f32 %v467_v37, %v976_v14  ;;  %v490_v8 = vmul.f32 %v467_v37, %v978_v15 }
 0x232   : > { %505 = vst [vmem:[%s1093_s10 + $0x50] sm:$0xff] %v489_v38  ;;  %506 = vst [vmem:[%s1093_s10 + $0x58] sm:$0xff] %v490_v8 }
 0x233   : > { %v472_v9 = vpop.permute.xlu1 %471 }
 0x234   : > { %v491_v39 = vmul.f32 %v472_v9, %v984_v18  ;;  %v492_v12 = vmul.f32 %v472_v9, %v986_v19 }
 0x236   : > { %507 = vst [vmem:[%s1093_s10 + $0x60] sm:$0xff] %v491_v39  ;;  %508 = vst [vmem:[%s1093_s10 + $0x68] sm:$0xff] %v492_v12 }
 0x237   : > { %v477_v13 = vpop.permute.xlu1 %476 }
 0x238   : > { %v493_v14 = vmul.f32 %v477_v13, %v988_v20  ;;  %v494_v15 = vmul.f32 %v477_v13, %v990_v21 }
 0x23a   : > { %509 = vst [vmem:[%s1093_s10 + $0x70] sm:$0xff] %v493_v14  ;;  %510 = vst [vmem:[%s1093_s10 + $0x78] sm:$0xff] %v494_v15 }
 0x23b   : > { %742 = shalt.err (!%p739_p2)
}
 0x23c   : > { %s743_s15 = scalar_lea.hbm %s1124_s26, 2048  ;;  %s747_s7 = scalar_lea.hbm %s1179_s5, 4096 }
 0x23d   : > { %p744_p4 = scmp.ne.s32.totalorder %s1124_s26, %s743_s15  ;;  %p748_p9 = scmp.lt.u32.totalorder %s1124_s26, %s1179_s5 }
 0x23e   : > { %p749_p1 = scmp.lt.u32.totalorder %s747_s7, %s743_s15  ;;  %p751_p6 = scmp.lt.u32.totalorder %s743_s15, %s1124_s26 }
 0x23f   : > { %p745_p5 = pnand %p744_p4, %p1186_p11 }
 0x240   : > { %p750_p3 = por %p749_p1, %p748_p9 }
 0x241   : > { %p746_p7 = pneg %p745_p5 }
 0x242   : > { %p752_p12 = por %p751_p6, %p750_p3 }
 0x244   : > { %p753_p13 = pnand %p752_p12, %p746_p7 }
 0x246   : > { %756 = shalt.err (!%p753_p13)
}
 0x247   : > { %s802_s25 = smov 256   ;;  %s803_s13 = smov 16  }
 0x248   : > { %616 = dma.vmem_to_hbm [thread:$0]  (%p1186_p11), %s1126_s11, 2048, %s1124_s26, %s512_s22, %s802_s25, %s802_s25, %s803_s13  }
 0x249 PF: > { %s540_s17 = sand.u32 1, %s783_s18   ;;  %p1187_p8 = scmp.ne.s32.totalorder %s1184_s6, 0 }
 0x24a   : > { %p1188_p10 = scmp.ge.s32.totalorder %s795_s21, 2  ;;  %s541_s28 = scalar_lea.sflag [#allocation4], %s540_s17 }
 0x24c   : > { %p623_p0 = pnand %p1188_p10, %p1187_p8 }
 0x24e   : > { %778 = dma.done.wait (!%p623_p0), %s541_s28, 2048  }
 0x24f   : > { %780 = vsyncadd (!%p623_p0), %s541_s28, 4294965248  ;;  %p18_p2 = scmp.ge.s32.totalorder %s859_s24, 4   ;;  %s1189_s18 = smov %s787_s19 }
 0x250   : > { %s1190_s19 = smov %s791_s20  ;;  %s1191_s20 = smov %s871_s27 }
 0x251   : > { %s1192_s21 = smov %s859_s24  ;;  %20 = sbr.rel (!%p18_p2) target bundleno = 5 (0x5), region = 85 }
 0x258   :  { %546 = vsyncpa [#allocation3], 1 }
 0x259   :  { %548 = vsyncpa [#allocation3 + $0x1], 1 }
 0x25a   :  { %549 = vsyncpa [#allocation4], 1 }
 0x25b   :  { %551 = vsyncpa [#allocation4 + $0x1], 1 }

</bundles_post_ra>
